<compile_context>
chip_gen: v5e
topology: v5e:2x2
jax: 0.10.0
libtpu: 0.0.40
codegen_flags: <defaults>
</compile_context>

<pallas_src>
from functools import partial

import jax
import jax.numpy as jnp
from jax.experimental import pallas as pl
from jax.experimental.pallas import tpu as pltpu

SUBLANES = 8


def attention_kernel(enc_ref, hid_ref, wt_ref, b_ref, out_ref, *, num_valid):
    """One row-tile (k axis) of the attention scorer.

    enc_ref : [T*PJ, H] bf16  encoder outputs, j padded only to a multiple of 8
    hid_ref : [T, H]    f32   decoder hidden rows for this tile
    wt_ref  : [H, H]    bf16  pre-transposed linear weight (y = x @ wt + bias)
    b_ref   : [1, H]    f32   linear bias
    out_ref : [T, PJ]   f32   row softmax (first `num_valid` columns are real)
    """
    tile, h = hid_ref.shape
    pj = out_ref.shape[1]

    # Linear on the MXU (bf16 inputs, f32 accumulation), bias on VPU, tanh on EUP.
    # `lin` is consumed immediately (single live [rows, H] f32 intermediate); the
    # reshape to 3-D is layout-preserving because pj % 8 == 0.
    energy = jnp.tanh(
        jnp.dot(enc_ref[...], wt_ref[...], preferred_element_type=jnp.float32)
        + b_ref[...]
    ).reshape(tile, pj, h)                                        # [T, PJ, H] f32

    # q == 1 score contraction stays off the MXU: VPU broadcast-multiply + XLU lane
    # reduce over H (co-issues with the MXU/EUP work of neighbouring grid steps).
    scores = jnp.sum(hid_ref[...][:, None, :] * energy, axis=-1)  # [T, PJ] f32

    if pj > num_valid:  # static branch: mask the sublane padding of the j axis
        col = jax.lax.broadcasted_iota(jnp.int32, (tile, pj), 1)
        scores = jnp.where(col < num_valid, scores, jnp.float32(-1e30))

    # Row softmax over j; exact divide (denominator is [T, 1], approx buys nothing).
    m = jnp.max(scores, axis=1, keepdims=True)
    e = jnp.exp(scores - m)
    out_ref[...] = (e / jnp.sum(e, axis=1, keepdims=True)).astype(out_ref.dtype)


def _choose_row_tile(S, pad_j, H):
    """Largest k-axis tile that divides S, keeps blocks sublane-aligned and fits VMEM."""
    lane_h = pl.cdiv(H, 128) * 128                     # f32 intermediates lane-pad H
    per_row = (
        2 * pad_j * H * 2                              # enc block (bf16, double-buffered)
        + pad_j * lane_h * 4                           # energy f32 intermediate
        + 4 * lane_h * 4                               # hid / scores / softmax temps
    )
    budget = 24 * 1024 * 1024                          # headroom under v7x's 64 MiB VMEM
    max_tile = max(SUBLANES, budget // per_row)
    if S > 128:
        # keep >= 2 grid steps so the "parallel" axis shards across v7x's 2 TensorCores
        max_tile = min(max_tile, pl.cdiv(S, 2))
    best = None
    for d in range(1, S + 1):
        if S % d == 0 and d <= max_tile and (d % SUBLANES == 0 or d == S):
            best = d
    return best if best is not None else S             # fall back to a single block


def attention_general(hidden, encoder_outputs, weight, bias):
    """hidden: [1, B, H], encoder_outputs: [S, B, H] (S == B), weight: [H, H], bias: [H]."""
    S, B, H = encoder_outputs.shape
    if S != B:
        raise ValueError(
            f"Attention_general's bmm requires seq_len == batch (S == B); got S={S}, B={B}"
        )
    assert hidden.shape == (1, B, H)

    pad_j = pl.cdiv(B, SUBLANES) * SUBLANES            # sublane-align the j axis only

    # ---- Wrapper-side plumbing: bf16 cast for the MXU; pad only if B % 8 != 0 ----
    enc = encoder_outputs.astype(jnp.bfloat16)         # streamed input DMA'd in bf16
    if pad_j != B:
        enc = jnp.pad(enc, ((0, 0), (0, pad_j - B), (0, 0)))
    enc2d = enc.reshape(S * pad_j, H)                  # contiguous reshape: no data movement
    hid2 = jnp.squeeze(hidden, axis=0).astype(jnp.float32)        # [B, H]
    w_t = jnp.transpose(weight).astype(jnp.bfloat16)              # y = x @ w_t + bias
    bias2 = bias.reshape(1, H).astype(jnp.float32)

    tile = _choose_row_tile(S, pad_j, H)

    # VMEM limit derived from the actual block sizes (clamped: fits v7x's 64 MiB physical
    # VMEM with headroom and overrides v5e's 16 MiB scoped default).
    lane_h = pl.cdiv(H, 128) * 128
    per_row = 2 * pad_j * H * 2 + pad_j * lane_h * 4 + 4 * lane_h * 4
    resident = 2 * (H * H * 2 + 128 * 4)               # W^T + bias (double-buffered worst case)
    est = tile * per_row + resident + (2 << 20)
    vmem_limit_bytes = int(min(max(est, 32 << 20), 48 << 20))

    def _resident_spec(shape, nbytes):
        kwargs = {}
        if nbytes >= (1 << 20):
            # single-buffer large constant-index operands so VMEM holds one copy of W^T
            kwargs["pipeline_mode"] = pl.Buffered(1)
        return pl.BlockSpec(shape, lambda i: (0, 0), **kwargs)

    kernel = partial(attention_kernel, num_valid=B)

    out_padded = pl.pallas_call(
        kernel,
        out_shape=jax.ShapeDtypeStruct((S, pad_j), jnp.float32),
        grid_spec=pltpu.PrefetchScalarGridSpec(
            num_scalar_prefetch=0,
            grid=(S // tile,),
            in_specs=[
                pl.BlockSpec((tile * pad_j, H), lambda i: (i, 0)),   # enc rows for this tile
                pl.BlockSpec((tile, H), lambda i: (i, 0)),           # hidden rows
                _resident_spec((H, H), H * H * 2),                   # W^T (resident)
                _resident_spec((1, H), H * 4),                       # bias (resident)
            ],
            out_specs=pl.BlockSpec((tile, pad_j), lambda i: (i, 0)),
        ),
        compiler_params=pltpu.CompilerParams(
            dimension_semantics=("parallel",),
            vmem_limit_bytes=vmem_limit_bytes,
        ),
    )(enc2d, hid2, w_t, bias2)

    return out_padded[:, :B]


def reference(hidden, encoder_outputs, weight, bias, matmul_dtype=jnp.float32):
    """Pure-JAX transcription of the PyTorch forward, for verification."""
    enc_p = jnp.transpose(encoder_outputs, (1, 0, 2))                     # [B, S, H]
    lin = jnp.dot(enc_p.astype(matmul_dtype), weight.T.astype(matmul_dtype),
                  preferred_element_type=jnp.float32) + bias
    energy = jnp.tanh(lin)                                                # [B, S, H]
    energy = jnp.transpose(energy, (1, 2, 0))                             # [S, H, B]
    hid_p = jnp.transpose(hidden, (1, 0, 2))                              # [B, 1, H]
    scores = jnp.matmul(hid_p, energy)[:, 0, :]                           # [B, B]
    return jax.nn.softmax(scores, axis=1)


if __name__ == "__main__":
    B = 8    # batch size
    S = 8    # sequence length (must equal B for the module's bmm to be valid)
    H = 32   # hidden_dim

    key = jax.random.PRNGKey(0)
    k1, k2, k3, k4 = jax.random.split(key, 4)

    hidden = jax.random.normal(k1, (1, B, H), dtype=jnp.float32)
    encoder_outputs = jax.random.normal(k2, (S, B, H), dtype=jnp.float32)

    # Deterministic nn.Linear(H, H)-style init: U(-1/sqrt(H), 1/sqrt(H))
    bound = 1.0 / (H ** 0.5)
    weight = jax.random.uniform(k3, (H, H), minval=-bound, maxval=bound, dtype=jnp.float32)
    bias = jax.random.uniform(k4, (H,), minval=-bound, maxval=bound, dtype=jnp.float32)

    out = attention_general(hidden, encoder_outputs, weight, bias)
    out = jax.block_until_ready(out)
    assert out.shape == (B, B)

    # Tight check vs. a precision-matched reference (same bf16 cast on the Linear inputs,
    # f32 everywhere else): the kernel math itself is exact (no approx reciprocal).
    ref_bf16 = reference(hidden, encoder_outputs, weight, bias, matmul_dtype=jnp.bfloat16)
    assert jnp.allclose(out, ref_bf16, atol=1e-3, rtol=1e-3), "mismatch vs matched reference"

    # Loose sanity check vs. the full-f32 reference (bf16 MXU inputs are the only
    # deliberate deviation from f32 arithmetic).
    ref_f32 = reference(hidden, encoder_outputs, weight, bias)
    assert jnp.allclose(out, ref_f32, atol=5e-2, rtol=5e-2), "mismatch vs f32 reference"

    print("KERNEL_OK")
</pallas_src>

<mosaic_0001>
module attributes {stable_mosaic.version = 11 : i64} {
  func.func @attention_kernel(%arg0: i32, %arg1: memref<64x32xbf16, #tpu.memory_space<vmem>>, %arg2: memref<8x32xf32, #tpu.memory_space<vmem>>, %arg3: memref<32x32xbf16, #tpu.memory_space<vmem>>, %arg4: memref<1x32xf32, #tpu.memory_space<vmem>>, %arg5: memref<8x8xf32, #tpu.memory_space<vmem>>) attributes {dimension_semantics = [#tpu.dimension_semantics<parallel>], iteration_bounds = array<i64: 1>, scalar_prefetch = 0 : i64, scratch_operands = 0 : i64, tpu.core_type = #tpu.core_type<tc>, window_params = [{transform_indices = @transform_0, window_bounds = array<i64: 64, 32>}, {transform_indices = @transform_1, window_bounds = array<i64: 8, 32>}, {pipeline_mode = #tpu.pipeline_mode<synchronous>, transform_indices = @transform_2, window_bounds = array<i64: 32, 32>}, {pipeline_mode = #tpu.pipeline_mode<synchronous>, transform_indices = @transform_3, window_bounds = array<i64: 1, 32>}, {transform_indices = @transform_4, window_bounds = array<i64: 8, 8>}]} {
    %c0 = arith.constant 0 : index
    %c0_0 = arith.constant 0 : index
    %0 = vector.load %arg1[%c0, %c0_0] : memref<64x32xbf16, #tpu.memory_space<vmem>>, vector<64x32xbf16>
    %c0_1 = arith.constant 0 : index
    %c0_2 = arith.constant 0 : index
    %1 = vector.load %arg3[%c0_1, %c0_2] : memref<32x32xbf16, #tpu.memory_space<vmem>>, vector<32x32xbf16>
    %cst = arith.constant dense<0.000000e+00> : vector<64x32xf32>
    %2 = tpu.matmul %0, %1, %cst {dimension_numbers = #tpu.dot_dimension_numbers<[1], [0], [0], [1], [0, 0, 1, 1], [], []>} : vector<64x32xbf16>, vector<32x32xbf16>, vector<64x32xf32> -> vector<64x32xf32>
    %c0_3 = arith.constant 0 : index
    %c0_4 = arith.constant 0 : index
    %3 = vector.load %arg4[%c0_3, %c0_4] : memref<1x32xf32, #tpu.memory_space<vmem>>, vector<1x32xf32>
    %4 = vector.broadcast %3 : vector<1x32xf32> to vector<64x32xf32>
    %5 = arith.addf %2, %4 : vector<64x32xf32>
    %6 = math.tanh %5 : vector<64x32xf32>
    %7 = vector.shape_cast %6 : vector<64x32xf32> to vector<8x8x32xf32>
    %c0_5 = arith.constant 0 : index
    %c0_6 = arith.constant 0 : index
    %8 = vector.load %arg2[%c0_5, %c0_6] : memref<8x32xf32, #tpu.memory_space<vmem>>, vector<8x32xf32>
    %9 = vector.shape_cast %8 : vector<8x32xf32> to vector<8x1x32xf32>
    %10 = vector.broadcast %9 : vector<8x1x32xf32> to vector<8x8x32xf32>
    %11 = arith.mulf %10, %7 : vector<8x8x32xf32>
    %cst_7 = arith.constant dense<0.000000e+00> : vector<8x8xf32>
    %12 = vector.multi_reduction <add>, %11, %cst_7 [2] : vector<8x8x32xf32> to vector<8x8xf32>
    %cst_8 = arith.constant dense<0xFF800000> : vector<8xf32>
    %13 = vector.multi_reduction <maximumf>, %12, %cst_8 [1] : vector<8x8xf32> to vector<8xf32>
    %14 = vector.shape_cast %13 : vector<8xf32> to vector<8x1xf32>
    %15 = vector.broadcast %14 : vector<8x1xf32> to vector<8x8xf32>
    %16 = arith.subf %12, %15 : vector<8x8xf32>
    %17 = math.exp %16 : vector<8x8xf32>
    %cst_9 = arith.constant dense<0.000000e+00> : vector<8xf32>
    %18 = vector.multi_reduction <add>, %17, %cst_9 [1] : vector<8x8xf32> to vector<8xf32>
    %19 = vector.shape_cast %18 : vector<8xf32> to vector<8x1xf32>
    %20 = vector.broadcast %19 : vector<8x1xf32> to vector<8x8xf32>
    %21 = arith.divf %17, %20 : vector<8x8xf32>
    %c0_10 = arith.constant 0 : index
    %c0_11 = arith.constant 0 : index
    %22 = vector.load %arg5[%c0_10, %c0_11] : memref<8x8xf32, #tpu.memory_space<vmem>>, vector<8x8xf32>
    tpu.vector_store %arg5[%c0_10, %c0_11], %21 {strides = array<i32>} : memref<8x8xf32, #tpu.memory_space<vmem>>, vector<8x8xf32>,
    return
  }
  func.func @transform_0(%arg0: i32) -> (i32, i32) {
    %c0_i32 = arith.constant 0 : i32
    %c0_i32_0 = arith.constant 0 : i32
    return %arg0, %c0_i32 : i32, i32
  }
  func.func @transform_1(%arg0: i32) -> (i32, i32) {
    %c0_i32 = arith.constant 0 : i32
    %c0_i32_0 = arith.constant 0 : i32
    return %arg0, %c0_i32 : i32, i32
  }
  func.func @transform_2(%arg0: i32) -> (i32, i32) {
    %c0_i32 = arith.constant 0 : i32
    %c0_i32_0 = arith.constant 0 : i32
    %c0_i32_1 = arith.constant 0 : i32
    return %c0_i32, %c0_i32_0 : i32, i32
  }
  func.func @transform_3(%arg0: i32) -> (i32, i32) {
    %c0_i32 = arith.constant 0 : i32
    %c0_i32_0 = arith.constant 0 : i32
    %c0_i32_1 = arith.constant 0 : i32
    return %c0_i32, %c0_i32_0 : i32, i32
  }
  func.func @transform_4(%arg0: i32) -> (i32, i32) {
    %c0_i32 = arith.constant 0 : i32
    %c0_i32_0 = arith.constant 0 : i32
    return %arg0, %c0_i32 : i32, i32
  }
}

</mosaic_0001>

<bundles_post_ra>
// kernel: tpu_custom_call.1
= control target key start
LH: loop header
LB: loop body
LE: loop exit
PB: predicated region body
PF: predicated region fallthrough
CT: control target
= control target key end

     0   :  { %s875_s0 = inlined_call_operand.vmem [shape: bf16[64,32], index: 0, kind: input, shape index: {}]   ;;  %s876_s1 = inlined_call_operand.vmem [shape: f32[8,32], index: 1, kind: input, shape index: {}]   ;;  %s877_s2 = inlined_call_operand.vmem [shape: bf16[32,32], index: 2, kind: input, shape index: {}]   ;;  %s878_s3 = inlined_call_operand.vmem [shape: f32[1,32], index: 3, kind: input, shape index: {}]   ;;  %s879_s4 = inlined_call_operand.hbm [shape: f32[8,8], index: 4, kind: output, shape index: {}]  }
   0x1   :  { %v538_v0 = vld [vmem:[%s877_s2 + $0x8] sm:$0xff]  ;;  %v537_v1 = vld [vmem:[%s877_s2] sm:$0xff] }
   0x2   :  { %86 = vmatpush.bf16.msra.mxu0 %v538_v0  ;;  %539 = vmatpush.bf16.msra.mxu1 %v538_v0 }
   0x3   :  { %9 = vsyncpa [#allocation3], 0  ;;  %540 = vmatpush.bf16.msra.mxu2 %v538_v0  ;;  %541 = vmatpush.bf16.msra.mxu3 %v538_v0  ;;  %v533_v2 = vld [vmem:[%s875_s0] sm:$0xff]  ;;  %v534_v3 = vld [vmem:[%s875_s0 + $0x8] sm:$0xff]  ;;  %vm67_vm0 = vcmask 261120   ;;  %vm192_vm1 = vcmask 1041409  }
   0x4   :  { %v535_v4 = vld [vmem:[%s875_s0 + $0x10] sm:$0xff]  ;;  %v536_v5 = vld [vmem:[%s875_s0 + $0x18] sm:$0xff]  ;;  %v550_v6 = vld [vmem:[%s878_s3] ss:$0 sm:$0xff]  ;;  %vm194_vm2 = vcmask 1042434   ;;  %vm196_vm3 = vcmask 1043459  }
   0x5   :  { %v117_v9 = vld [vmem:[%s876_s1] sm:$0xff]  ;;  %vm198_vm4 = vcmask 1044484   ;;  %vm200_vm5 = vcmask 1045509   ;;  %vm202_vm6 = vcmask 1046534   ;;  %vm881_vm7 = vcmask 1047559   ;;  %s626_s0 = smov [#allocation2]  }
   0x6   :  { %87 = vmatpush.bf16.msra.mxu0 %v537_v1  ;;  %542 = vmatpush.bf16.msra.mxu1 %v537_v1  ;;  %v120_v12 = vrot.slane %v117_v9, 2  ;;  %v126_v13 = vperm.slane %v117_v9, 0  ;;  %v122_v23 = vrot.slane %v117_v9, 4  ;;  %v119_v27 = vrot.slane %v117_v9, 1  ;;  %s494_s1 = sshll.u32 %s626_s0, 4  ;;  %s496_s5 = sshll.u32 %s879_s4, 4  ;;  %s495_s1 = int_to_ptr.vmem [resolvable:$true] %s494_s1  ;;  %s497_s5 = int_to_ptr.hbm [resolvable:$true] %s496_s5 }
   0x7   :  { %543 = vmatpush.bf16.msra.mxu2 %v537_v1  ;;  %544 = vmatpush.bf16.msra.mxu3 %v537_v1  ;;  %v121_v30 = vrot.slane %v117_v9, 3  ;;  %v123_v41 = vrot.slane %v117_v9, 5  ;;  %v124_v42 = vrot.slane %v117_v9, 6  ;;  %v125_v44 = vrot.slane %v117_v9, 7 }
   0x8   :  { %v128_v16 = vperm.slane %v120_v12, 0  ;;  %v130_v32 = vperm.slane %v122_v23, 0  ;;  %v127_v35 = vperm.slane %v119_v27, 0  ;;  %v182_v1 = vlaneseq }
   0x9   :  { %529 = vmatmul.msk.bf16.vlgmr.msra.gmra.mxu0 %vm67_vm0, %v533_v2  ;;  %530 = vmatmul.msk.bf16.vlgmr.msra.gmra.mxu1 %vm67_vm0, %v534_v3  ;;  %v129_v39 = vperm.slane %v121_v30, 0  ;;  %v131_v50 = vperm.slane %v123_v41, 0  ;;  %v132_v51 = vperm.slane %v124_v42, 0  ;;  %v133_v54 = vperm.slane %v125_v44, 0 }
   0xa   :  { %531 = vmatmul.msk.bf16.vlgmr.msra.gmra.mxu2 %vm67_vm0, %v535_v4  ;;  %532 = vmatmul.msk.bf16.vlgmr.msra.gmra.mxu3 %vm67_vm0, %v536_v5  ;;  %v688_v2 = vand.u32 127, %v182_v1  ;;  %vm880_vm8 = vcmask 64512  }
  0x86   :  { %v89_v7 = vpop.f32.mrf.mxu0  ;;  %v94_v8 = vpop.f32.mrf.mxu1 }
  0x87   :  { %v90_v10 = vadd.f32 %v550_v6, %v89_v7  ;;  %v95_v11 = vadd.f32 %v550_v6, %v94_v8 }
  0x89   :  { %551 = vtanh.f32 %v90_v10 }
  0x8a   :  { %553 = vtanh.f32 %v95_v11 }
  0x8d   :  { %v99_v14 = vpop.f32.mrf.mxu2  ;;  %v104_v15 = vpop.f32.mrf.mxu3 }
  0x8e   :  { %v100_v17 = vadd.f32 %v550_v6, %v99_v14  ;;  %v91_v18 = vpop.f32.mrf.mxu0  ;;  %v96_v19 = vpop.f32.mrf.mxu1  ;;  %v105_v28 = vadd.f32 %v550_v6, %v104_v15 }
  0x8f   :  { %v552_v20 = vpop.eup %551  ;;  %v92_v21 = vadd.f32 %v550_v6, %v91_v18  ;;  %v97_v22 = vadd.f32 %v550_v6, %v96_v19 }
  0x90   :  { %v554_v24 = vpop.eup %553  ;;  %555 = vtanh.f32 %v100_v17  ;;  %v142_v25 = vmul.f32 %v552_v20, %v126_v13 }
  0x91   :  { %v144_v26 = vmul.f32 %v554_v24, %v128_v16  ;;  %557 = vtanh.f32 %v92_v21 }
  0x92   :  { %v150_v29 = vsel %vm67_vm0, %v142_v25, 0.0  ;;  %559 = vtanh.f32 %v97_v22  ;;  %v625_v25 = vmov 0  }
  0x93   :  { %v156_v31 = vsel %vm67_vm0, %v144_v26, 0.0  ;;  %151 = vadd.xlane.f32.xlu0 %v150_v29  ;;  %561 = vtanh.f32 %v105_v28  ;;  %549 = vset.pattern.permute.xlu2 %v625_v25 }
  0x94   :  { %157 = vadd.xlane.f32.xlu1 %v156_v31  ;;  %547 = vset.pattern.permute.xlu0 %v625_v25 }
  0x95   :  { %v101_v33 = vpop.f32.mrf.mxu2  ;;  %v106_v34 = vpop.f32.mrf.mxu3  ;;  %548 = vset.pattern.permute.xlu1 %v625_v25 }
  0x96   :  { %v556_v36 = vpop.eup %555  ;;  %v102_v37 = vadd.f32 %v550_v6, %v101_v33  ;;  %v107_v38 = vadd.f32 %v550_v6, %v106_v34 }
  0x97   :  { %v146_v40 = vmul.f32 %v556_v36, %v130_v32  ;;  %v558_v43 = vpop.eup %557 }
  0x98   :  { %563 = vtanh.f32 %v102_v37  ;;  %v560_v45 = vpop.eup %559  ;;  %v143_v47 = vmul.f32 %v558_v43, %v127_v35 }
  0x99   :  { %565 = vtanh.f32 %v107_v38  ;;  %v162_v46 = vsel %vm67_vm0, %v146_v40, 0.0  ;;  %v145_v48 = vmul.f32 %v560_v45, %v129_v39  ;;  %v562_v52 = vpop.eup %561 }
  0x9a   :  { %163 = vadd.xlane.f32.xlu2 %v162_v46  ;;  %v153_v49 = vsel %vm67_vm0, %v143_v47, 0.0  ;;  %v148_v58 = vmul.f32 %v562_v52, %v132_v51 }
  0x9b   :  { %v159_v53 = vsel %vm67_vm0, %v145_v48, 0.0  ;;  %154 = vadd.xlane.f32.xlu0 %v153_v49 }
  0x9c   :  { %160 = vadd.xlane.f32.xlu1 %v159_v53  ;;  %v168_v61 = vsel %vm67_vm0, %v148_v58, 0.0 }
  0x9e   :  { %v564_v55 = vpop.eup %563 }
  0x9f   :  { %v566_v56 = vpop.eup %565  ;;  %v147_v57 = vmul.f32 %v564_v55, %v131_v50 }
  0xa0   :  { %v149_v59 = vmul.f32 %v566_v56, %v133_v54 }
  0xa1   :  { %v165_v60 = vsel %vm67_vm0, %v147_v57, 0.0 }
  0xa2   :  { %166 = vadd.xlane.f32.xlu2 %v165_v60  ;;  %v171_v62 = vsel %vm67_vm0, %v149_v59, 0.0 }
  0xa3   :  { %169 = vadd.xlane.f32.xlu0 %v168_v61 }
  0xa4   :  { %172 = vadd.xlane.f32.xlu1 %v171_v62 }
 0x106   :  { %v152_v63 = vpop.xlane.xlu0 %151 }
 0x107   :  { %v158_v0 = vpop.xlane.xlu1 %157  ;;  %v184_v5 = vperm.slane %v152_v63, %v688_v2 }
 0x108   :  { %v186_v8 = vperm.slane %v158_v0, %v688_v2 }
 0x10d   :  { %v164_v3 = vpop.xlane.xlu2 %163 }
 0x10e   :  { %v155_v4 = vpop.xlane.xlu0 %154  ;;  %v188_v13 = vperm.slane %v164_v3, %v688_v2 }
 0x10f   :  { %v161_v6 = vpop.xlane.xlu1 %160  ;;  %v185_v7 = vperm.slane %v155_v4, %v688_v2 }
 0x110   :  { %v187_v9 = vperm.slane %v161_v6, %v688_v2 }
 0x111   :  { %v193_v10 = vsel %vm192_vm1, %v185_v7, %v184_v5 }
 0x112   :  { %v195_v11 = vsel %vm194_vm2, %v186_v8, %v193_v10 }
 0x113   :  { %v197_v12 = vsel %vm196_vm3, %v187_v9, %v195_v11 }
 0x114   :  { %v199_v17 = vsel %vm198_vm4, %v188_v13, %v197_v12 }
 0x115   :  { %v167_v14 = vpop.xlane.xlu2 %166 }
 0x116   :  { %v189_v15 = vperm.slane %v167_v14, %v688_v2  ;;  %v170_v16 = vpop.xlane.xlu0 %169 }
 0x117   :  { %v173_v18 = vpop.xlane.xlu1 %172  ;;  %v190_v19 = vperm.slane %v170_v16, %v688_v2 }
 0x118   :  { %v201_v20 = vsel %vm200_vm5, %v189_v15, %v199_v17  ;;  %v191_v21 = vperm.slane %v173_v18, %v688_v2 }
 0x119   :  { %v203_v22 = vsel %vm202_vm6, %v190_v19, %v201_v20 }
 0x11a   :  { %v205_v23 = vsel %vm881_vm7, %v191_v21, %v203_v22 }
 0x11b   :  { %v208_v24 = vsel %vm880_vm8, %v205_v23, -inf }
 0x11c   :  { %209 = vmax.xlane.f32.xlu2 %v208_v24 }
 0x18f   :  { %v210_v26 = vpop.xlane.xlu2 %209 }
 0x190   :  { %v214_v27 = vperm.slane %v210_v26, 2  ;;  %v213_v28 = vperm.slane %v210_v26, 1  ;;  %v212_v29 = vperm.slane %v210_v26, 0  ;;  %v215_v33 = vperm.slane %v210_v26, 3 }
 0x191   :  { %v216_v34 = vperm.slane %v210_v26, 4  ;;  %v219_v35 = vperm.slane %v210_v26, 7  ;;  %v217_v43 = vperm.slane %v210_v26, 5  ;;  %v218_v45 = vperm.slane %v210_v26, 6 }
 0x192   :  { %v230_v30 = vsub.f32 %v158_v0, %v214_v27  ;;  %v229_v31 = vsub.f32 %v155_v4, %v213_v28  ;;  %v228_v32 = vsub.f32 %v152_v63, %v212_v29  ;;  %v231_v39 = vsub.f32 %v161_v6, %v215_v33 }
 0x193   :  { %v232_v40 = vsub.f32 %v164_v3, %v216_v34  ;;  %v235_v41 = vsub.f32 %v173_v18, %v219_v35  ;;  %v233_v50 = vsub.f32 %v167_v14, %v217_v43  ;;  %v234_v51 = vsub.f32 %v170_v16, %v218_v45 }
 0x194   :  { %v240_v36 = vmul.f32 1.442695, %v230_v30  ;;  %v238_v37 = vmul.f32 1.442695, %v229_v31  ;;  %v236_v38 = vmul.f32 1.442695, %v228_v32 }
 0x195   :  { %v242_v42 = vmul.f32 1.442695, %v231_v39  ;;  %v244_v44 = vmul.f32 1.442695, %v232_v40  ;;  %v250_v47 = vmul.f32 1.442695, %v235_v41 }
 0x196   :  { %567 = vpow2.f32 %v240_v36  ;;  %v246_v52 = vmul.f32 1.442695, %v233_v50  ;;  %v248_v53 = vmul.f32 1.442695, %v234_v51 }
 0x197   :  { %569 = vpow2.f32 %v238_v37 }
 0x198   :  { %571 = vpow2.f32 %v236_v38 }
 0x199   :  { %573 = vpow2.f32 %v242_v42 }
 0x19a   :  { %575 = vpow2.f32 %v244_v44 }
 0x19b   :  { %577 = vpow2.f32 %v250_v47 }
 0x19c   :  { %v706_v46 = vpop.eup %567  ;;  %579 = vpow2.f32 %v246_v52 }
 0x19d   :  { %v708_v48 = vpop.eup %569  ;;  %267 = vperm.xlu2 %549, %v706_v46   ;;  %581 = vpow2.f32 %v248_v53 }
 0x19e   :  { %v711_v49 = vpop.eup %571  ;;  %264 = vperm.xlu1 %548, %v708_v48  }
 0x19f   :  { %261 = vperm.xlu0 %547, %v711_v49   ;;  %v715_v54 = vpop.eup %573 }
 0x1a0   :  { %v717_v55 = vpop.eup %575 }
 0x1a1   :  { %v720_v56 = vpop.eup %577 }
 0x1a2   :  { %v724_v57 = vpop.eup %579 }
 0x1a3   :  { %v726_v58 = vpop.eup %581 }
 0x1a5   :  { %270 = vperm.xlu2 %549, %v715_v54  }
 0x1a6   :  { %273 = vperm.xlu1 %548, %v717_v55  }
 0x1a7   :  { %282 = vperm.xlu0 %547, %v720_v56  }
 0x1ad   :  { %276 = vperm.xlu2 %549, %v724_v57  }
 0x1ae   :  { %279 = vperm.xlu1 %548, %v726_v58  }
 0x1f7   :  { %v268_v59 = vpop.permute.xlu2 %267 }
 0x1f8   :  { %v286_v4 = vperm.slane %v268_v59, %v688_v2 }
 0x1ff   :  { %v271_v62 = vpop.permute.xlu2 %270 }
 0x200   :  { %v287_v7 = vperm.slane %v271_v62, %v688_v2 }
 0x207   :  { %v277_v8 = vpop.permute.xlu2 %276 }
 0x208   :  { %v289_v12 = vperm.slane %v277_v8, %v688_v2 }
 0x210   :  { %v265_v60 = vpop.permute.xlu1 %264 }
 0x211   :  { %v262_v61 = vpop.permute.xlu0 %261  ;;  %v285_v63 = vperm.slane %v265_v60, %v688_v2 }
 0x212   :  { %v284_v0 = vperm.slane %v262_v61, %v688_v2 }
 0x214   :  { %v292_v1 = vsel %vm192_vm1, %v285_v63, %v284_v0 }
 0x215   :  { %v293_v5 = vsel %vm194_vm2, %v286_v4, %v292_v1 }
 0x216   :  { %v294_v9 = vsel %vm196_vm3, %v287_v7, %v293_v5 }
 0x218   :  { %v274_v3 = vpop.permute.xlu1 %273 }
 0x219   :  { %v288_v6 = vperm.slane %v274_v3, %v688_v2  ;;  %v283_v11 = vpop.permute.xlu0 %282 }
 0x21a   :  { %v291_v15 = vperm.slane %v283_v11, %v688_v2 }
 0x21b   :  { %v295_v10 = vsel %vm198_vm4, %v288_v6, %v294_v9 }
 0x21c   :  { %v296_v16 = vsel %vm200_vm5, %v289_v12, %v295_v10 }
 0x220   :  { %v280_v13 = vpop.permute.xlu1 %279 }
 0x221   :  { %v290_v14 = vperm.slane %v280_v13, %v688_v2 }
 0x223   :  { %v297_v17 = vsel %vm202_vm6, %v290_v14, %v296_v16 }
 0x224   :  { %v298_v18 = vsel %vm881_vm7, %v291_v15, %v297_v17 }
 0x225   :  { %v300_v19 = vsel %vm880_vm8, %v298_v18, 0.0 }
 0x226   :  { %301 = vadd.xlane.f32.xlu2 %v300_v19 }
 0x299   :  { %v302_v20 = vpop.xlane.xlu2 %301 }
 0x29a   :  { %v304_v21 = vperm.slane %v302_v20, 0  ;;  %v305_v22 = vperm.slane %v302_v20, 1  ;;  %v746_v23 = vperm.slane %v302_v20, 2  ;;  %v748_v24 = vperm.slane %v302_v20, 3 }
 0x29b   :  { %v750_v25 = vperm.slane %v302_v20, 4  ;;  %v752_v26 = vperm.slane %v302_v20, 5  ;;  %v758_v31 = vperm.slane %v302_v20, 7  ;;  %v760_v34 = vperm.slane %v302_v20, 6 }
 0x29c   :  { %583 = vrcp.f32 %v304_v21  ;;  %v344_v27 = vand.u32 2147483647, %v305_v22  ;;  %v346_v28 = vand.u32 2147483648, %v305_v22  ;;  %v329_v29 = vand.u32 2147483647, %v304_v21 }
 0x29d   :  { %585 = vrcp.f32 %v305_v22  ;;  %v331_v32 = vand.u32 2147483648, %v304_v21  ;;  %vm340_vm9 = vweird.f32 %v305_v22  ;;  %vm325_vm11 = vweird.f32 %v304_v21 }
 0x29e   :  { %587 = vrcp.f32 %v746_v23  ;;  %vm764_vm10 = vcmp.eq.f32.partialorder %v344_v27, 8.507059e+37  ;;  %v347_v40 = vor.u32 1.1754944e-38, %v346_v28  ;;  %vm770_vm12 = vcmp.eq.f32.partialorder %v329_v29, 8.507059e+37 }
 0x29f   :  { %589 = vrcp.f32 %v748_v24  ;;  %v332_v47 = vor.u32 1.1754944e-38, %v331_v32  ;;  %v376_v0 = vand.u32 2147483648, %v748_v24  ;;  %v361_v3 = vand.u32 2147483648, %v746_v23 }
 0x2a0   :  { %591 = vrcp.f32 %v750_v25  ;;  %v359_v16 = vand.u32 2147483647, %v746_v23  ;;  %v374_v18 = vand.u32 2147483647, %v748_v24  ;;  %v406_v28 = vand.u32 2147483648, %v752_v26 }
 0x2a1   :  { %593 = vrcp.f32 %v752_v26  ;;  %v389_v38 = vand.u32 2147483647, %v750_v25 }
 0x2a2   :  { %v584_v30 = vpop.eup %583  ;;  %595 = vrcp.f32 %v758_v31 }
 0x2a3   :  { %v586_v33 = vpop.eup %585  ;;  %v321_v35 = vmul.f32 %v584_v30, %v304_v21  ;;  %vm326_vm13 = vweird.f32 %v584_v30  ;;  %597 = vrcp.f32 %v760_v34  ;;  %v362_v21 = vor.u32 1.1754944e-38, %v361_v3 }
 0x2a4   :  { %v762_v36 = vpop.eup %587  ;;  %v336_v37 = vmul.f32 %v586_v33, %v305_v22  ;;  %vm341_vm14 = vweird.f32 %v586_v33  ;;  %vm327_vm15 = vmor %vm325_vm11, %vm326_vm13  ;;  %vm370_vm11 = vweird.f32 %v748_v24  ;;  %vm375_vm13 = vcmp.eq.f32.partialorder %v374_v18, 8.507059e+37 }
 0x2a5   :  { %v768_v39 = vpop.eup %589  ;;  %v322_v41 = vsub.f32 1.0, %v321_v35  ;;  %v351_v43 = vmul.f32 %v762_v36, %v746_v23  ;;  %vm356_vm0 = vweird.f32 %v762_v36  ;;  %vm342_vm8 = vmor %vm340_vm9, %vm341_vm14  ;;  %vm355_vm9 = vweird.f32 %v746_v23 }
 0x2a6   :  { %v776_v44 = vpop.eup %591  ;;  %v337_v45 = vsub.f32 1.0, %v336_v37  ;;  %v366_v50 = vmul.f32 %v768_v39, %v748_v24  ;;  %vm371_vm7 = vweird.f32 %v768_v39  ;;  %v377_v24 = vor.u32 1.1754944e-38, %v376_v0 }
 0x2a7   :  { %v781_v51 = vpop.eup %593  ;;  %v323_v52 = vmul.f32 %v584_v30, %v322_v41  ;;  %v352_v53 = vsub.f32 1.0, %v351_v43  ;;  %v381_v59 = vmul.f32 %v776_v44, %v750_v25  ;;  %v391_v35 = vand.u32 2147483648, %v750_v25 }
 0x2a8   :  { %v338_v60 = vmul.f32 %v586_v33, %v337_v45  ;;  %v367_v61 = vsub.f32 1.0, %v366_v50  ;;  %v396_v62 = vmul.f32 %v781_v51, %v752_v26  ;;  %v797_v9 = vpop.eup %595  ;;  %vm401_vm14 = vweird.f32 %v781_v51 }
 0x2a9   :  { %v324_v63 = vadd.f32 %v584_v30, %v323_v52  ;;  %v353_v1 = vmul.f32 %v762_v36, %v352_v53  ;;  %v382_v8 = vsub.f32 1.0, %v381_v59  ;;  %v816_v20 = vpop.eup %597  ;;  %v426_v23 = vmul.f32 %v797_v9, %v758_v31 }
 0x2aa   :  { %v339_v4 = vadd.f32 %v586_v33, %v338_v60  ;;  %v368_v5 = vmul.f32 %v768_v39, %v367_v61  ;;  %v397_v13 = vsub.f32 1.0, %v396_v62  ;;  %v411_v32 = vmul.f32 %v816_v20, %v760_v34 }
 0x2ab   :  { %v328_v6 = vsel %vm327_vm15, %v584_v30, %v324_v63  ;;  %v354_v7 = vadd.f32 %v762_v36, %v353_v1  ;;  %vm385_vm15 = vweird.f32 %v750_v25  ;;  %v404_v41 = vand.u32 2147483647, %v752_v26 }
 0x2ac   :  { %v343_v10 = vsel %vm342_vm8, %v586_v33, %v339_v4  ;;  %v333_v11 = vsel %vm770_vm12, %v332_v47, %v328_v6  ;;  %v369_v12 = vadd.f32 %v768_v39, %v368_v5  ;;  %vm357_vm8 = vmor %vm355_vm9, %vm356_vm0  ;;  %v398_v22 = vmul.f32 %v781_v51, %v397_v13 }
 0x2ad   :  { %v348_v14 = vsel %vm764_vm10, %v347_v40, %v343_v10  ;;  %v334_v15 = vmul.f32 %v711_v49, %v333_v11  ;;  %vm372_vm12 = vmor %vm370_vm11, %vm371_vm7  ;;  %v358_v19 = vsel %vm357_vm8, %v762_v36, %v354_v7  ;;  %v383_v49 = vmul.f32 %v776_v44, %v382_v8 }
 0x2ae   :  { %v349_v17 = vmul.f32 %v708_v48, %v348_v14  ;;  %v373_v48 = vsel %vm372_vm12, %v768_v39, %v369_v12  ;;  %vm360_vm10 = vcmp.eq.f32.partialorder %v359_v16, 8.507059e+37  ;;  %vm386_vm7 = vweird.f32 %v776_v44 }
 0x2af   :  { %449 = vperm.xlu1 %548, %v334_v15   ;;  %v363_v27 = vsel %vm360_vm10, %v362_v21, %v358_v19  ;;  %v378_v29 = vsel %vm375_vm13, %v377_v24, %v373_v48  ;;  %v384_v30 = vadd.f32 %v776_v44, %v383_v49  ;;  %v399_v33 = vadd.f32 %v781_v51, %v398_v22  ;;  %vm387_vm9 = vmor %vm385_vm15, %vm386_vm7 }
 0x2b0   :  { %452 = vperm.xlu0 %547, %v349_v17   ;;  %v427_v36 = vsub.f32 1.0, %v426_v23  ;;  %v364_v37 = vmul.f32 %v706_v46, %v363_v27  ;;  %v412_v39 = vsub.f32 1.0, %v411_v32  ;;  %v379_v40 = vmul.f32 %v715_v54, %v378_v29 }
 0x2b1   :  { %vm400_vm0 = vweird.f32 %v752_v26  ;;  %v388_v42 = vsel %vm387_vm9, %v776_v44, %v384_v30  ;;  %v392_v45 = vor.u32 1.1754944e-38, %v391_v35  ;;  %v407_v47 = vor.u32 1.1754944e-38, %v406_v28 }
 0x2b2   :  { %vm402_vm11 = vmor %vm400_vm0, %vm401_vm14  ;;  %v413_v43 = vmul.f32 %v816_v20, %v412_v39  ;;  %v428_v25 = vmul.f32 %v797_v9, %v427_v36  ;;  %vm390_vm8 = vcmp.eq.f32.partialorder %v389_v38, 8.507059e+37  ;;  %vm405_vm12 = vcmp.eq.f32.partialorder %v404_v41, 8.507059e+37 }
 0x2b3   :  { %v403_v46 = vsel %vm402_vm11, %v781_v51, %v399_v33  ;;  %v393_v54 = vsel %vm390_vm8, %v392_v45, %v388_v42  ;;  %vm416_vm10 = vweird.f32 %v816_v20  ;;  %vm431_vm13 = vweird.f32 %v797_v9 }
 0x2b4   :  { %v408_v50 = vsel %vm405_vm12, %v407_v47, %v403_v46  ;;  %v414_v26 = vadd.f32 %v816_v20, %v413_v43  ;;  %v429_v52 = vadd.f32 %v797_v9, %v428_v25  ;;  %v421_v44 = vand.u32 2147483648, %v760_v34 }
 0x2b5   :  { %v394_v51 = vmul.f32 %v717_v55, %v393_v54  ;;  %v436_v53 = vand.u32 2147483648, %v758_v31  ;;  %vm415_vm7 = vweird.f32 %v760_v34  ;;  %v419_v59 = vand.u32 2147483647, %v760_v34 }
 0x2b6   :  { %v409_v60 = vmul.f32 %v724_v57, %v408_v50  ;;  %vm430_vm14 = vweird.f32 %v758_v31  ;;  %v434_v61 = vand.u32 2147483647, %v758_v31  ;;  %vm417_vm15 = vmor %vm415_vm7, %vm416_vm10  ;;  %v422_v63 = vor.u32 1.1754944e-38, %v421_v44 }
 0x2b7   :  { %455 = vperm.xlu1 %548, %v364_v37   ;;  %vm432_vm0 = vmor %vm430_vm14, %vm431_vm13  ;;  %v418_v62 = vsel %vm417_vm15, %v816_v20, %v414_v26  ;;  %v437_v0 = vor.u32 1.1754944e-38, %v436_v53  ;;  %vm420_vm9 = vcmp.eq.f32.partialorder %v419_v59, 8.507059e+37 }
 0x2b8   :  { %458 = vperm.xlu0 %547, %v379_v40   ;;  %v433_v55 = vsel %vm432_vm0, %v797_v9, %v429_v52  ;;  %vm435_vm11 = vcmp.eq.f32.partialorder %v434_v61, 8.507059e+37  ;;  %v423_v1 = vsel %vm420_vm9, %v422_v63, %v418_v62 }
 0x2b9   :  { %v438_v34 = vsel %vm435_vm11, %v437_v0, %v433_v55  ;;  %v424_v57 = vmul.f32 %v726_v58, %v423_v1 }
 0x2ba   :  { %v439_v3 = vmul.f32 %v720_v56, %v438_v34 }
 0x2bf   :  { %461 = vperm.xlu1 %548, %v394_v51  }
 0x2c0   :  { %464 = vperm.xlu0 %547, %v409_v60  }
 0x2c7   :  { %467 = vperm.xlu1 %548, %v424_v57  }
 0x2c8   :  { %470 = vperm.xlu0 %547, %v439_v3  }
 0x321   :  { %v450_v31 = vpop.permute.xlu1 %449 }
 0x322   :  { %v453_v4 = vpop.permute.xlu0 %452  ;;  %v472_v8 = vperm.slane %v450_v31, %v688_v2 }
 0x323   :  { %v473_v7 = vperm.slane %v453_v4, %v688_v2 }
 0x325   :  { %v480_v12 = vsel %vm192_vm1, %v473_v7, %v472_v8  ;;  %vm886_vm1 = vcmask 1047559  }
 0x329   :  { %v456_v5 = vpop.permute.xlu1 %455 }
 0x32a   :  { %v459_v6 = vpop.permute.xlu0 %458  ;;  %v474_v9 = vperm.slane %v456_v5, %v688_v2 }
 0x32b   :  { %v475_v58 = vperm.slane %v459_v6, %v688_v2 }
 0x32c   :  { %v481_v56 = vsel %vm194_vm2, %v474_v9, %v480_v12  ;;  %vm887_vm2 = vcmask 64512  }
 0x32d   :  { %v482_v15 = vsel %vm196_vm3, %v475_v58, %v481_v56 }
 0x331   :  { %v462_v10 = vpop.permute.xlu1 %461 }
 0x332   :  { %v465_v11 = vpop.permute.xlu0 %464  ;;  %v476_v13 = vperm.slane %v462_v10, %v688_v2 }
 0x333   :  { %v477_v14 = vperm.slane %v465_v11, %v688_v2 }
 0x334   :  { %v483_v16 = vsel %vm198_vm4, %v476_v13, %v482_v15 }
 0x335   :  { %v484_v20 = vsel %vm200_vm5, %v477_v14, %v483_v16 }
 0x339   :  { %v468_v17 = vpop.permute.xlu1 %467 }
 0x33a   :  { %v471_v18 = vpop.permute.xlu0 %470  ;;  %v478_v19 = vperm.slane %v468_v17, %v688_v2 }
 0x33b   :  { %v479_v49 = vperm.slane %v471_v18, %v688_v2 }
 0x33c   :  { %v485_v48 = vsel %vm202_vm6, %v478_v19, %v484_v20 }
 0x33d   :  { %v486_v21 = vsel %vm886_vm1, %v479_v49, %v485_v48 }
 0x33e   :  { %488 = vst.msk [vmem:[#allocation2] sm:$0xff] %vm887_vm2, %v486_v21 }
 0x33f   :  { %499 = dma.vmem_to_hbm [thread:$0]  %s495_s1, 128, %s497_s5, [#allocation3]  }
 0x340   :  { %623 = dma.done.wait [#allocation3], 128  }
 0x341   :  { %624 = vsyncadd [#allocation3], 4294967168 }
 0x342   :  { %504 = vsyncpa [#allocation3], 1 }

</bundles_post_ra>
